<compile_context>
chip_gen: v7x
topology: tpu7x:2x2x1
jax: 0.10.0
libtpu: 0.0.40
codegen_flags: <defaults>
</compile_context>

<pallas_src>
import functools

import jax
import jax.numpy as jnp
from jax import lax
from jax.experimental import pallas as pl
from jax.experimental.pallas import tpu as pltpu


def _cdiv(a: int, b: int) -> int:
    return -(-a // b)


def _round_up(a: int, b: int) -> int:
    return _cdiv(a, b) * b


def _vmem_limit_bytes(need: int) -> int:
    """Per-chip scoped-VMEM limit: generous on v5e/v6e (128 MiB), capped on v7x."""
    phys = 64 * 1024 * 1024          # conservative fallback (v7x per-TC VMEM)
    try:
        info = pltpu.get_tpu_info()
        phys = int(getattr(info, "vmem_capacity_bytes", phys) or phys)
    except Exception:
        pass
    ceiling = max(32 * 1024 * 1024, phys - 8 * 1024 * 1024)   # Mosaic scratch headroom
    return int(min(ceiling, max(32 * 1024 * 1024, 2 * need)))


def _scl_kernel(xm_ref, xh_ref, w_ref, o_ref, panel_ref, *,
                kh_size, kw_size, width, c_in, tm):
    """One (image, spatial-tile) grid step.

    xm_ref:    (1, C_in, TM)        main input tile (wide rows [t*TM, (t+1)*TM))
    xh_ref:    (1, C_in, HB)        halo tile: the next HB lanes after the main tile
    w_ref:     (C_out, KH*KW*C_in)  folded weights (constant block, resident)
    o_ref:     (1, C_out, TM)       output tile; wide row m = i*W + j holds the conv
                                    output at (i, j) for j < W_out, junk otherwise
                                    (dropped by the wrapper).
    panel_ref: (KH*KW*C_in, TM)     VMEM im2col panel scratch
    """
    # (C_in, TM + HB) window; every further slice below is static.
    x = jnp.concatenate([xm_ref[0], xh_ref[0]], axis=-1)

    idx = 0
    for dh in range(kh_size):
        for dw in range(kw_size):
            off = dh * width + dw                       # static lane shift of this tap
            panel_ref[pl.ds(idx * c_in, c_in), :] = x[:, off:off + tm]
            idx += 1

    # Single MXU matmul, contraction K = KH*KW*C_in, f32 accumulation.
    acc = jnp.dot(w_ref[...], panel_ref[...],
                  preferred_element_type=jnp.float32,
                  precision=lax.Precision.HIGHEST)
    o_ref[0] = acc.astype(o_ref.dtype)


def scl_forward(x: jax.Array, kernel_A: jax.Array, *, compute_dtype=None) -> jax.Array:
    """Forward of SCL: fixed-weight Conv2d(stride=1, padding=0, bias=False).

    x:        (N, C_in, H, W)        NCHW, like PyTorch
    kernel_A: (C_out, C_in, KH, KW)  OIHW, like PyTorch
    returns:  (N, C_out, H-KH+1, W-KW+1)
    """
    N, C_in, H, W = x.shape
    C_out, C_in2, KH, KW = kernel_A.shape
    assert C_in == C_in2, (C_in, C_in2)
    H_out, W_out = H - KH + 1, W - KW + 1
    assert H_out >= 1 and W_out >= 1

    out_dtype = x.dtype
    cdtype = jnp.dtype(compute_dtype) if compute_dtype is not None else jnp.dtype(x.dtype)
    item = cdtype.itemsize
    out_item = jnp.dtype(out_dtype).itemsize

    K_fold = KH * KW * C_in
    M_wide = H_out * W                        # "wide" output rows per image
    halo = (KH - 1) * W + (KW - 1)            # lanes a tile reads past its own end
    HB = 128 * max(1, _cdiv(halo, 128))       # halo block size (multiple of 128)

    # Spatial tile TM: multiple of HB (so the halo BlockSpec lines up exactly),
    # roughly half an image (>= 2 tiles -> both v7x TensorCores busy at N == 1),
    # capped so panel + double-buffered tiles stay a few MiB.
    tile_budget = 6 * 1024 * 1024
    per_lane = (K_fold + 3 * C_in) * item + C_out * (2 * out_item + 4)
    tm_cap = max(HB, (tile_budget // per_lane) // HB * HB)
    tm_pref = _round_up(max(1, _cdiv(M_wide, 2)), HB)
    TM = max(HB, min(tm_pref, tm_cap))
    T = _cdiv(M_wide, TM)
    M_pad = T * TM
    L_pad = M_pad + HB
    tm_over_hb = TM // HB

    # Glue (no transposes): NCHW -> (N, C_in, H*W); zero-pad the lane axis so the
    # last tile's halo reads stay in bounds.
    x_flat = x.reshape(N, C_in, H * W).astype(cdtype)
    x_flat = jnp.pad(x_flat, ((0, 0), (0, 0), (0, L_pad - H * W)))

    # OIHW -> (C_out, KH, KW, C_in) -> (C_out, KH*KW*C_in); row order matches the
    # im2col panel built in the kernel (row = (kh*KW + kw)*C_in + ci).
    w2 = jnp.transpose(kernel_A, (0, 2, 3, 1)).reshape(C_out, K_fold).astype(cdtype)

    kernel = functools.partial(_scl_kernel, kh_size=KH, kw_size=KW, width=W,
                               c_in=C_in, tm=TM)

    vmem_need = (2 * C_in * (TM + HB) * item      # double-buffered main + halo tiles
                 + 2 * C_out * K_fold * item      # folded weights (double-buffered)
                 + 2 * C_out * TM * out_item      # double-buffered output tile
                 + K_fold * TM * item             # im2col panel scratch
                 + C_in * (TM + HB) * item        # concatenated window temp
                 + C_out * TM * 4)                # f32 matmul result
    vmem_limit = _vmem_limit_bytes(vmem_need)

    cost = pl.CostEstimate(
        flops=2 * N * M_pad * K_fold * C_out,
        transcendentals=0,
        bytes_accessed=int(N * C_in * L_pad * item + N * T * C_in * HB * item
                           + w2.size * item + N * C_out * M_pad * out_item))

    out_wide = pl.pallas_call(
        kernel,
        out_shape=jax.ShapeDtypeStruct((N, C_out, M_pad), out_dtype),
        grid_spec=pltpu.PrefetchScalarGridSpec(
            num_scalar_prefetch=0,
            grid=(N, T),
            in_specs=[
                # main spatial tile: wide rows [t*TM, (t+1)*TM)
                pl.BlockSpec((1, C_in, TM), lambda n, t: (n, 0, t)),
                # halo tile: the next HB lanes after the main tile (HB | TM)
                pl.BlockSpec((1, C_in, HB),
                             lambda n, t: (n, 0, (t + 1) * tm_over_hb)),
                # folded weights, constant block index -> fetched once, resident
                # TODO(synk): on v7x, stage large weights once via memory_space=pl.ANY
                # + make_async_copy instead of a double-buffered BlockSpec.
                pl.BlockSpec((C_out, K_fold), lambda n, t: (0, 0)),
            ],
            out_specs=pl.BlockSpec((1, C_out, TM), lambda n, t: (n, 0, t)),
            scratch_shapes=[pltpu.VMEM((K_fold, TM), cdtype)],
        ),
        compiler_params=pltpu.CompilerParams(
            dimension_semantics=("parallel", "parallel"),
            vmem_limit_bytes=vmem_limit,
        ),
        cost_estimate=cost,
    )(x_flat, x_flat, w2)

    # Drop padded wide rows and the j >= W_out junk columns; already NCHW.
    out = out_wide[:, :, :M_wide].reshape(N, C_out, H_out, W)[:, :, :, :W_out]
    return out


if __name__ == "__main__":
    key = jax.random.PRNGKey(0)
    k_x, k_w = jax.random.split(key)

    N, C_in, H, W = 2, 4, 16, 16
    C_out, KH, KW = 8, 3, 3

    x = jax.random.normal(k_x, (N, C_in, H, W), dtype=jnp.float32)
    kernel_A = jax.random.normal(k_w, (C_out, C_in, KH, KW), dtype=jnp.float32)

    ref = jax.lax.conv_general_dilated(
        x, kernel_A, window_strides=(1, 1), padding="VALID",
        dimension_numbers=("NCHW", "OIHW", "NCHW"),
        precision=lax.Precision.HIGHEST)

    # f32 path: keeps the PyTorch module's f32 conv semantics.
    out = jax.block_until_ready(jax.jit(scl_forward)(x, kernel_A))
    assert out.shape == (N, C_out, H - KH + 1, W - KW + 1), out.shape
    assert jnp.allclose(out, ref, atol=1e-3, rtol=1e-3), float(
        jnp.max(jnp.abs(out - ref)))

    # bf16 fast path (halved HBM reads, native bf16 MXU), f32 accumulation.
    scl_bf16 = jax.jit(functools.partial(scl_forward, compute_dtype=jnp.bfloat16))
    out_bf16 = jax.block_until_ready(scl_bf16(x, kernel_A))
    x_r = x.astype(jnp.bfloat16).astype(jnp.float32)
    w_r = kernel_A.astype(jnp.bfloat16).astype(jnp.float32)
    ref_bf16 = jax.lax.conv_general_dilated(
        x_r, w_r, window_strides=(1, 1), padding="VALID",
        dimension_numbers=("NCHW", "OIHW", "NCHW"),
        precision=lax.Precision.HIGHEST)
    assert jnp.allclose(out_bf16, ref_bf16, atol=2e-2, rtol=2e-2), float(
        jnp.max(jnp.abs(out_bf16 - ref_bf16)))

    print("KERNEL_OK")
</pallas_src>

<mosaic_0001>
module attributes {stable_mosaic.version = 11 : i64} {
  func.func @_scl_kernel(%arg0: i32, %arg1: i32, %arg2: memref<1x4x128xf32, #tpu.memory_space<vmem>>, %arg3: memref<1x4x128xf32, #tpu.memory_space<vmem>>, %arg4: memref<8x36xf32, #tpu.memory_space<vmem>>, %arg5: memref<1x8x128xf32, #tpu.memory_space<vmem>>, %arg6: memref<36x128xf32, #tpu.memory_space<vmem>>) attributes {dimension_semantics = [#tpu.dimension_semantics<parallel>, #tpu.dimension_semantics<parallel>], iteration_bounds = array<i64: 2, 2>, scalar_prefetch = 0 : i64, scratch_operands = 1 : i64, tpu.core_type = #tpu.core_type<tc>, window_params = [{transform_indices = @transform_0, window_bounds = array<i64: 1, 4, 128>}, {transform_indices = @transform_1, window_bounds = array<i64: 1, 4, 128>}, {pipeline_mode = #tpu.pipeline_mode<synchronous>, transform_indices = @transform_2, window_bounds = array<i64: 8, 36>}, {transform_indices = @transform_3, window_bounds = array<i64: 1, 8, 128>}]} {
    %c0 = arith.constant 0 : index
    %c0_0 = arith.constant 0 : index
    %c0_1 = arith.constant 0 : index
    %0 = vector.load %arg2[%c0, %c0_0, %c0_1] : memref<1x4x128xf32, #tpu.memory_space<vmem>>, vector<1x4x128xf32>
    %1 = vector.shape_cast %0 : vector<1x4x128xf32> to vector<4x128xf32>
    %c0_2 = arith.constant 0 : index
    %c0_3 = arith.constant 0 : index
    %c0_4 = arith.constant 0 : index
    %2 = vector.load %arg3[%c0_2, %c0_3, %c0_4] : memref<1x4x128xf32, #tpu.memory_space<vmem>>, vector<1x4x128xf32>
    %3 = vector.shape_cast %2 : vector<1x4x128xf32> to vector<4x128xf32>
    %4 = tpu.concatenate %1, %3 in 1 : vector<4x128xf32>, vector<4x128xf32> -> vector<4x256xf32>
    %5 = vector.extract_strided_slice %4 {offsets = [0, 0], sizes = [4, 128], strides = [1, 1]} : vector<4x256xf32> to vector<4x128xf32>
    %c0_5 = arith.constant 0 : index
    %c0_6 = arith.constant 0 : index
    %6 = vector.load %arg6[%c0_5, %c0_6] : memref<36x128xf32, #tpu.memory_space<vmem>>, vector<4x128xf32>
    tpu.vector_store %arg6[%c0_5, %c0_6], %5 {strides = array<i32>} : memref<36x128xf32, #tpu.memory_space<vmem>>, vector<4x128xf32>,
    %7 = vector.extract_strided_slice %4 {offsets = [0, 1], sizes = [4, 128], strides = [1, 1]} : vector<4x256xf32> to vector<4x128xf32>
    %c4 = arith.constant 4 : index
    %c0_7 = arith.constant 0 : index
    %8 = vector.load %arg6[%c4, %c0_7] : memref<36x128xf32, #tpu.memory_space<vmem>>, vector<4x128xf32>
    tpu.vector_store %arg6[%c4, %c0_7], %7 {strides = array<i32>} : memref<36x128xf32, #tpu.memory_space<vmem>>, vector<4x128xf32>,
    %9 = vector.extract_strided_slice %4 {offsets = [0, 2], sizes = [4, 128], strides = [1, 1]} : vector<4x256xf32> to vector<4x128xf32>
    %c8 = arith.constant 8 : index
    %c0_8 = arith.constant 0 : index
    %10 = vector.load %arg6[%c8, %c0_8] : memref<36x128xf32, #tpu.memory_space<vmem>>, vector<4x128xf32>
    tpu.vector_store %arg6[%c8, %c0_8], %9 {strides = array<i32>} : memref<36x128xf32, #tpu.memory_space<vmem>>, vector<4x128xf32>,
    %11 = vector.extract_strided_slice %4 {offsets = [0, 16], sizes = [4, 128], strides = [1, 1]} : vector<4x256xf32> to vector<4x128xf32>
    %c12 = arith.constant 12 : index
    %c0_9 = arith.constant 0 : index
    %12 = vector.load %arg6[%c12, %c0_9] : memref<36x128xf32, #tpu.memory_space<vmem>>, vector<4x128xf32>
    tpu.vector_store %arg6[%c12, %c0_9], %11 {strides = array<i32>} : memref<36x128xf32, #tpu.memory_space<vmem>>, vector<4x128xf32>,
    %13 = vector.extract_strided_slice %4 {offsets = [0, 17], sizes = [4, 128], strides = [1, 1]} : vector<4x256xf32> to vector<4x128xf32>
    %c16 = arith.constant 16 : index
    %c0_10 = arith.constant 0 : index
    %14 = vector.load %arg6[%c16, %c0_10] : memref<36x128xf32, #tpu.memory_space<vmem>>, vector<4x128xf32>
    tpu.vector_store %arg6[%c16, %c0_10], %13 {strides = array<i32>} : memref<36x128xf32, #tpu.memory_space<vmem>>, vector<4x128xf32>,
    %15 = vector.extract_strided_slice %4 {offsets = [0, 18], sizes = [4, 128], strides = [1, 1]} : vector<4x256xf32> to vector<4x128xf32>
    %c20 = arith.constant 20 : index
    %c0_11 = arith.constant 0 : index
    %16 = vector.load %arg6[%c20, %c0_11] : memref<36x128xf32, #tpu.memory_space<vmem>>, vector<4x128xf32>
    tpu.vector_store %arg6[%c20, %c0_11], %15 {strides = array<i32>} : memref<36x128xf32, #tpu.memory_space<vmem>>, vector<4x128xf32>,
    %17 = vector.extract_strided_slice %4 {offsets = [0, 32], sizes = [4, 128], strides = [1, 1]} : vector<4x256xf32> to vector<4x128xf32>
    %c24 = arith.constant 24 : index
    %c0_12 = arith.constant 0 : index
    %18 = vector.load %arg6[%c24, %c0_12] : memref<36x128xf32, #tpu.memory_space<vmem>>, vector<4x128xf32>
    tpu.vector_store %arg6[%c24, %c0_12], %17 {strides = array<i32>} : memref<36x128xf32, #tpu.memory_space<vmem>>, vector<4x128xf32>,
    %19 = vector.extract_strided_slice %4 {offsets = [0, 33], sizes = [4, 128], strides = [1, 1]} : vector<4x256xf32> to vector<4x128xf32>
    %c28 = arith.constant 28 : index
    %c0_13 = arith.constant 0 : index
    %20 = vector.load %arg6[%c28, %c0_13] : memref<36x128xf32, #tpu.memory_space<vmem>>, vector<4x128xf32>
    tpu.vector_store %arg6[%c28, %c0_13], %19 {strides = array<i32>} : memref<36x128xf32, #tpu.memory_space<vmem>>, vector<4x128xf32>,
    %21 = vector.extract_strided_slice %4 {offsets = [0, 34], sizes = [4, 128], strides = [1, 1]} : vector<4x256xf32> to vector<4x128xf32>
    %c32 = arith.constant 32 : index
    %c0_14 = arith.constant 0 : index
    %22 = vector.load %arg6[%c32, %c0_14] : memref<36x128xf32, #tpu.memory_space<vmem>>, vector<4x128xf32>
    tpu.vector_store %arg6[%c32, %c0_14], %21 {strides = array<i32>} : memref<36x128xf32, #tpu.memory_space<vmem>>, vector<4x128xf32>,
    %c0_15 = arith.constant 0 : index
    %c0_16 = arith.constant 0 : index
    %23 = vector.load %arg4[%c0_15, %c0_16] : memref<8x36xf32, #tpu.memory_space<vmem>>, vector<8x36xf32>
    %c0_17 = arith.constant 0 : index
    %c0_18 = arith.constant 0 : index
    %24 = vector.load %arg6[%c0_17, %c0_18] : memref<36x128xf32, #tpu.memory_space<vmem>>, vector<36x128xf32>
    %cst = arith.constant dense<0.000000e+00> : vector<8x128xf32>
    %25 = tpu.matmul %23, %24, %cst {dimension_numbers = #tpu.dot_dimension_numbers<[1], [0], [0], [1], [0, 0, 1, 1], [], []>, precision = #tpu.contract_precision<fp32>} : vector<8x36xf32>, vector<36x128xf32>, vector<8x128xf32> -> vector<8x128xf32>
    %c0_19 = arith.constant 0 : index
    %c0_20 = arith.constant 0 : index
    %c0_21 = arith.constant 0 : index
    %26 = vector.load %arg5[%c0_19, %c0_20, %c0_21] : memref<1x8x128xf32, #tpu.memory_space<vmem>>, vector<1x8x128xf32>
    %27 = vector.shape_cast %26 : vector<1x8x128xf32> to vector<8x128xf32>
    %28 = vector.shape_cast %25 : vector<8x128xf32> to vector<1x8x128xf32>
    tpu.vector_store %arg5[%c0_19, %c0_20, %c0_21], %28 {strides = array<i32>} : memref<1x8x128xf32, #tpu.memory_space<vmem>>, vector<1x8x128xf32>,
    return
  }
  func.func @transform_0(%arg0: i32, %arg1: i32) -> (i32, i32, i32) {
    %c0_i32 = arith.constant 0 : i32
    %c0_i32_0 = arith.constant 0 : i32
    return %arg0, %c0_i32, %arg1 : i32, i32, i32
  }
  func.func @transform_1(%arg0: i32, %arg1: i32) -> (i32, i32, i32) {
    %c1_i32 = arith.constant 1 : i32
    %0 = arith.addi %arg1, %c1_i32 : i32
    %c1_i32_0 = arith.constant 1 : i32
    %1 = arith.muli %0, %c1_i32_0 : i32
    %c0_i32 = arith.constant 0 : i32
    %c0_i32_1 = arith.constant 0 : i32
    return %arg0, %c0_i32, %1 : i32, i32, i32
  }
  func.func @transform_2(%arg0: i32, %arg1: i32) -> (i32, i32) {
    %c0_i32 = arith.constant 0 : i32
    %c0_i32_0 = arith.constant 0 : i32
    %c0_i32_1 = arith.constant 0 : i32
    return %c0_i32, %c0_i32_0 : i32, i32
  }
  func.func @transform_3(%arg0: i32, %arg1: i32) -> (i32, i32, i32) {
    %c0_i32 = arith.constant 0 : i32
    %c0_i32_0 = arith.constant 0 : i32
    return %arg0, %c0_i32, %arg1 : i32, i32, i32
  }
}

</mosaic_0001>

<bundles_post_ra>
// kernel: scl_forward.1
= control target key start
LH: loop header
LB: loop body
LE: loop exit
PB: predicated region body
PF: predicated region fallthrough
CT: control target
= control target key end

     0   :  { %s1219_s12 = smov 0   ;;  %s1221_s13 = smov 0   ;;  %s1348_s0 = inlined_call_operand.vmem [shape: f32[2,4,384], index: 0, kind: input, shape index: {}, may-alias: {0,1}]   ;;  %s1349_s1 = inlined_call_operand.vmem [shape: f32[2,4,384], index: 1, kind: input, shape index: {}, may-alias: {0,1}]   ;;  %s1350_s2 = inlined_call_operand.vmem [shape: f32[8,36], index: 2, kind: input, shape index: {}]   ;;  %s1351_s3 = inlined_call_operand.vmem [shape: f32[2,8,256], index: 3, kind: output, shape index: {}]  }
   0x1   :  { %s1223_s14 = smov 0   ;;  %s1225_s15 = smov 0  }
   0x2   :  { %s1227_s16 = smov 0  }
   0x3 LB: > { %s22_s17 = sadd.s32 1, %s1178_s14  ;;  %s25_s18 = sadd.s32 1, %s1182_s15  ;;  %s1186_s16 = sphi %s1227_s16, %s13_s16   ;;  %s1182_s15 = sphi %s1225_s15, %s1355_s15   ;;  %s1178_s14 = sphi %s1223_s14, %s1354_s14   ;;  %s1174_s13 = sphi %s1221_s13, %s1353_s13   ;;  %s1170_s12 = sphi %s1219_s12, %s1352_s12  }
   0x4   : > { %p23_p0 = scmp.ge.s32.totalorder %s22_s17, 2  ;;  %p930_p1 = scmp.ge.s32.totalorder %s1186_s16, 1 }
   0x5   : > { %p175_p2 = scmp.lt.s32.totalorder %s1186_s16, 5 }
   0x6   : > { %s1357_s17 = smov (%p23_p0, %s22_s17), 0  ;;  %s1359_s18 = smov (!%p23_p0, %s25_s18), %s1182_s15 }
   0x7   : > { %p176_p3 = pnand %p930_p1, %p175_p2  ;;  %p27_p4 = scmp.ge.s32.totalorder %s1359_s18, 2 }
   0x8   : > { %p214_p5 = scmp.lt.s32.totalorder (!%p176_p3), %s1174_s13, 1  ;;  %p216_p6 = scmp.lt.s32.totalorder (!%p176_p3), %s1170_s12, 2  ;;  %v1190_v2 = vmov (!%p176_p3), 0.0|0.0   ;;  %vm1197_vm0 = vmmov (!%p176_p3), 0   ;;  %v1198_v3 = vmov (!%p176_p3), 0.0   ;;  %vm257_vm1 = vcmask (!%p176_p3), 1031168  }
   0x9   : > { %s1361_s18 = smov (%p27_p4, %s1359_s18), 0  ;;  %179 = sbr.rel (%p176_p3) target bundleno = 418 (0x1a2), region = 32 }
   0xa   : > { %s222_s21 = sadd.s32 (!%p176_p3), 1, %s1170_s12  ;;  %s1188_s27 = smov (!%p176_p3), 126   ;;  %1051 = vmatprep.subr.bf16.mxu1 (!%p176_p3), %v1190_v2  ;;  %1069 = vmatprep.subr.bf16.mxu0 (!%p176_p3), %v1190_v2  ;;  %vm249_vm2 = vcmask (!%p176_p3), 1039360   ;;  %vm265_vm3 = vcmask (!%p176_p3), 916480   ;;  %vm273_vm4 = vcmask (!%p176_p3), 908288   ;;  %vm281_vm5 = vcmask (!%p176_p3), 900096  }
   0xb   : > { %p225_p7 = scmp.lt.s32.totalorder (!%p176_p3), %s222_s21, 2  ;;  %s1189_s28 = smov (!%p176_p3), 127   ;;  %983 = vmatprep.mubr.msk.f32.mxu1 (!%p176_p3), %vm1197_vm0, %v1198_v3  ;;  %1022 = vmatprep.mubr.msk.f32.mxu0 (!%p176_p3), %vm1197_vm0, %v1198_v3  ;;  %vm289_vm6 = vcmask (!%p176_p3), 785408   ;;  %v309_v23 = vld [vmem:[%s1350_s2] sm:$0xff] (!%p176_p3)  ;;  %vm315_vm7 = vcmask (!%p176_p3), 293888   ;;  %vm297_vm8 = vcmask (!%p176_p3), 777216  }
   0xc   : > { %s1191_s7 = smov (!%p176_p3), 112   ;;  %s1192_s8 = smov (!%p176_p3), 111   ;;  %v317_v28 = vsel (!%p176_p3), %vm315_vm7, %v309_v23, 0  ;;  %vm305_vm9 = vcmask (!%p176_p3), 769024   ;;  %vm319_vm10 = vcmask (!%p176_p3), 1043456  }
   0xd   : > { %s1193_s9 = smov (!%p176_p3), 110   ;;  %s1194_s10 = smov (!%p176_p3), 96   ;;  %v1278_v31 = vand.u32 (!%p176_p3), 4294901760, %v317_v28 }
   0xe   : > { %s1195_s11 = smov (!%p176_p3), 95   ;;  %p234_p8 = scmp.lt.s32.totalorder (!%p176_p3), %s1170_s12, 1 }
   0xf   : > { %v1283_v37 = vsub.f32 (!%p176_p3), %v317_v28, %v1278_v31 }
  0x10   : > { %s1363_s13 = smov (!%p214_p5, %s1174_s13), 1  ;;  %s1365_s21 = smov (!%p225_p7, %s222_s21), 2 }
  0x11   : > { %s217_s19 = scalar_select %p216_p6, %s1170_s12, 2  ;;  %v395_v42 = vand.u32 4294901760, %v1283_v37 }
  0x12   : > { %s1096_s20 = smul.u32 3, %s1363_s13  ;;  %s1367_s12 = smov (!%p234_p8, %s1170_s12), 1 }
  0x13   : > { %v396_v50 = vsub.f32 %v1283_v37, %v395_v42 }
  0x14   : > { %s219_s22 = sadd.s32 %s1096_s20, %s217_s19  ;;  %s228_s29 = sadd.s32 %s1096_s20, %s1365_s21 }
  0x15   : > { %s931_s23 = sshll.u32 %s219_s22, 2  ;;  %s932_s30 = sshll.u32 %s228_s29, 2  ;;  %v397_v58 = vand.u32 4294901760, %v396_v50 }
  0x16   : > { %s221_s26 = scalar_lea.vmem %s1348_s0, %s931_s23  ;;  %s230_s6 = scalar_lea.vmem %s1349_s1, %s932_s30 }
  0x17   : > { %v240_v0 = vld [vmem:[%s221_s26] sm:$0xf]  ;;  %s1196_s19 = smov 94   ;;  %s933_s22 = sshll.u32 %s1363_s13, 1 }
  0x18   : > { %253 = vrot.lane.b32.xlu1 %v240_v0, %s1188_s27  ;;  %242 = vst [vmem:[#allocation2] sm:$0xf] %v240_v0  ;;  %245 = vrot.lane.b32.xlu0 %v240_v0, %s1189_s28  ;;  %v241_v1 = vld [vmem:[%s230_s6] sm:$0xf]  ;;  %s237_s23 = sadd.s32 %s933_s22, %s1367_s12 }
  0x19   : > { %s934_s24 = sshll.u32 %s237_s23, 3 }
  0x1c   : > { %255 = vrot.lane.b32.xlu1 %v241_v1, %s1188_s27  ;;  %247 = vrot.lane.b32.xlu0 %v241_v1, %s1189_s28  ;;  %s239_s27 = scalar_lea.vmem %s1351_s3, %s934_s24 }
  0x20   : > { %263 = vrot.lane.b32.xlu1 %v241_v1, %s1191_s7  ;;  %261 = vrot.lane.b32.xlu0 %v240_v0, %s1191_s7 }
  0x24   : > { %271 = vrot.lane.b32.xlu1 %v241_v1, %s1192_s8  ;;  %269 = vrot.lane.b32.xlu0 %v240_v0, %s1192_s8 }
  0x28   : > { %279 = vrot.lane.b32.xlu1 %v241_v1, %s1193_s9  ;;  %277 = vrot.lane.b32.xlu0 %v240_v0, %s1193_s9 }
  0x2c   : > { %287 = vrot.lane.b32.xlu1 %v241_v1, %s1194_s10  ;;  %285 = vrot.lane.b32.xlu0 %v240_v0, %s1194_s10 }
  0x30   : > { %295 = vrot.lane.b32.xlu1 %v241_v1, %s1195_s11  ;;  %293 = vrot.lane.b32.xlu0 %v240_v0, %s1195_s11 }
  0x34   : > { %303 = vrot.lane.b32.xlu1 %v241_v1, %s1196_s19  ;;  %301 = vrot.lane.b32.xlu0 %v240_v0, %s1196_s19 }
  0x8a   : > { %v254_v4 = vpop.permute.xlu1 %253  ;;  %v246_v5 = vpop.permute.xlu0 %245 }
  0x8e   : > { %v256_v6 = vpop.permute.xlu1 %255  ;;  %v248_v7 = vpop.permute.xlu0 %247 }
  0x8f   : > { %v258_v8 = vsel %vm257_vm1, %v254_v4, %v256_v6  ;;  %v250_v9 = vsel %vm249_vm2, %v246_v5, %v248_v7 }
  0x90   : > { %260 = vst [vmem:[#allocation2 + $0x8] sm:$0xf] %v258_v8  ;;  %252 = vst [vmem:[#allocation2 + $0x4] sm:$0xf] %v250_v9 }
  0x92   : > { %v264_v10 = vpop.permute.xlu1 %263  ;;  %v262_v11 = vpop.permute.xlu0 %261 }
  0x93   : > { %v266_v12 = vsel %vm265_vm3, %v262_v11, %v264_v10 }
  0x94   : > { %268 = vst [vmem:[#allocation2 + $0xc] sm:$0xf] %v266_v12 }
  0x96   : > { %v272_v13 = vpop.permute.xlu1 %271  ;;  %v270_v14 = vpop.permute.xlu0 %269 }
  0x97   : > { %v274_v15 = vsel %vm273_vm4, %v270_v14, %v272_v13  ;;  %v310_v16 = vld [vmem:[#allocation2] sm:$0xff] }
  0x98   : > { %276 = vst [vmem:[#allocation2 + $0x10] sm:$0xf] %v274_v15  ;;  %v324_v21 = vand.u32 4294901760, %v310_v16 }
  0x9a   : > { %v280_v17 = vpop.permute.xlu1 %279  ;;  %v278_v18 = vpop.permute.xlu0 %277  ;;  %v1285_v38 = vsub.f32 %v310_v16, %v324_v21 }
  0x9b   : > { %v282_v19 = vsel %vm281_vm5, %v278_v18, %v280_v17  ;;  %v311_v20 = vld [vmem:[#allocation2 + $0x8] sm:$0xff] }
  0x9c   : > { %284 = vst [vmem:[#allocation2 + $0x14] sm:$0xf] %v282_v19  ;;  %v327_v22 = vand.u32 4294901760, %v311_v20  ;;  %v406_v45 = vand.u32 4294901760, %v1285_v38 }
  0x9e   : > { %v288_v24 = vpop.permute.xlu1 %287  ;;  %v286_v25 = vpop.permute.xlu0 %285  ;;  %v1272_v26 = vpack.c.bf16 %v327_v22, %v324_v21  ;;  %v1280_v34 = vsub.f32 %v311_v20, %v327_v22  ;;  %v407_v52 = vsub.f32 %v1285_v38, %v406_v45 }
  0x9f   : > { %v290_v27 = vsel %vm289_vm6, %v286_v25, %v288_v24 }
  0xa0   : > { %292 = vst [vmem:[#allocation2 + $0x18] sm:$0xf] %v290_v27  ;;  %1053 = vmatpush3.bf16.msra.mxu1 %v1272_v26  ;;  %1071 = vmatpush3.bf16.msra.mxu0 %v1272_v26  ;;  %v413_v41 = vand.u32 4294901760, %v1280_v34  ;;  %v408_v61 = vand.u32 4294901760, %v407_v52  ;;  %v1064_v10 = vpack.c.bf16 %v1280_v34, %v1285_v38 }
  0xa1   : > { %1054 = vmatprep.subr.bf16.mxu1 %v1190_v2  ;;  %1072 = vmatprep.subr.bf16.mxu0 %v1190_v2 }
  0xa2   : > { %v296_v29 = vpop.permute.xlu1 %295  ;;  %v294_v30 = vpop.permute.xlu0 %293  ;;  %v414_v47 = vsub.f32 %v1280_v34, %v413_v41  ;;  %v1076_v0 = vpack.c.bf16 %v413_v41, %v406_v45 }
  0xa3   : > { %v298_v32 = vsel %vm297_vm8, %v294_v30, %v296_v29  ;;  %v312_v33 = vld [vmem:[#allocation2 + $0x10] sm:$0xff] }
  0xa4   : > { %300 = vst [vmem:[#allocation2 + $0x1c] sm:$0xf] %v298_v32  ;;  %v330_v40 = vand.u32 4294901760, %v312_v33  ;;  %v415_v57 = vand.u32 4294901760, %v414_v47 }
  0xa6   : > { %v304_v35 = vpop.permute.xlu1 %303  ;;  %v302_v36 = vpop.permute.xlu0 %301  ;;  %v1289_v44 = vsub.f32 %v312_v33, %v330_v40  ;;  %v1058_v63 = vpack.c.bf16 %v415_v57, %v408_v61 }
  0xa7   : > { %v306_v39 = vsel %vm305_vm9, %v302_v36, %v304_v35 }
  0xa8   : > { %308 = vst [vmem:[#allocation2 + $0x20] sm:$0xf] %v306_v39  ;;  %v420_v53 = vand.u32 4294901760, %v1289_v44 }
  0xaa   : > { %v421_v62 = vsub.f32 %v1289_v44, %v420_v53 }
  0xab   : > { %v313_v43 = vld [vmem:[#allocation2 + $0x18] sm:$0xff] }
  0xac   : > { %v333_v46 = vand.u32 4294901760, %v313_v43  ;;  %v422_v5 = vand.u32 4294901760, %v421_v62 }
  0xae   : > { %v1055_v48 = vpack.c.bf16 %v333_v46, %v330_v40  ;;  %v426_v49 = vsub.f32 %v313_v43, %v333_v46 }
  0xaf   : > { %v314_v51 = vld [vmem:[#allocation2 + $0x20] sm:$0xf] }
  0xb0   : > { %1056 = vmatpush3.bf16.msra.mxu1 %v1055_v48  ;;  %1074 = vmatpush3.bf16.msra.mxu0 %v1055_v48  ;;  %v321_v54 = vsel %vm319_vm10, %v314_v51, 0  ;;  %v427_v55 = vand.u32 4294901760, %v426_v49  ;;  %v1067_v11 = vpack.c.bf16 %v426_v49, %v1289_v44 }
  0xb1   : > { %981 = vmatprep.subr.mxu1 %v1198_v3  ;;  %1020 = vmatprep.subr.mxu0 %v1198_v3  ;;  %v336_v56 = vand.u32 4294901760, %v321_v54 }
  0xb2   : > { %v428_v59 = vsub.f32 %v426_v49, %v427_v55  ;;  %v1079_v7 = vpack.c.bf16 %v427_v55, %v420_v53 }
  0xb3   : > { %v433_v60 = vsub.f32 %v321_v54, %v336_v56 }
  0xb4   : > { %982 = vmatpush3.msra.mxu1 %v336_v56  ;;  %1021 = vmatpush3.msra.mxu0 %v336_v56  ;;  %v429_v1 = vand.u32 4294901760, %v428_v59 }
  0xb5   : > { %1057 = vmatprep.subr.bf16.mxu1 %v1190_v2  ;;  %1075 = vmatprep.subr.bf16.mxu0 %v1190_v2  ;;  %v434_v4 = vand.u32 4294901760, %v433_v60 }
  0xb6   : > { %984 = vmatmul.mubr.f32.vlgmr.msra.gmra.mrb[0].mxu1 %v397_v58  ;;  %1023 = vmatmul.mubr.f32.vlgmr.msra.gmra.mrb[0].mxu0 %v395_v42  ;;  %v1061_v6 = vpack.c.bf16 %v429_v1, %v422_v5 }
  0xb7   : > { %1059 = vmatpush3.bf16.msra.mxu1 %v1058_v63  ;;  %1077 = vmatpush3.bf16.msra.mxu0 %v1076_v0  ;;  %v435_v8 = vsub.f32 %v433_v60, %v434_v4 }
  0xb8   : > { %1060 = vmatprep.subr.bf16.mxu1 %v1190_v2  ;;  %1078 = vmatprep.subr.bf16.mxu0 %v1190_v2 }
  0xb9   : > { %996 = vmatprep.mubr.msk.f32.mxu1 %vm1197_vm0, %v1198_v3  ;;  %1035 = vmatprep.mubr.msk.f32.mxu0 %vm1197_vm0, %v1198_v3  ;;  %v436_v9 = vand.u32 4294901760, %v435_v8 }
  0xbb   : > { %1062 = vmatpush3.bf16.msra.mxu1 %v1061_v6  ;;  %1080 = vmatpush3.bf16.msra.mxu0 %v1079_v7 }
  0xbc   : > { %994 = vmatprep.subr.mxu1 %v1198_v3  ;;  %1033 = vmatprep.subr.mxu0 %v1198_v3 }
  0xbf   : > { %995 = vmatpush3.msra.mxu1 %v436_v9  ;;  %1034 = vmatpush3.msra.mxu0 %v434_v4 }
  0xc0   : > { %1063 = vmatprep.subr.bf16.mxu1 %v1190_v2  ;;  %1081 = vmatprep.subr.bf16.mxu0 %v1190_v2 }
  0xc1   : > { %997 = vmatmul.mubr.f32.vlgmr.msra.gmra.mrb[0].mxu1 %v1278_v31  ;;  %1036 = vmatmul.mubr.f32.vlgmr.msra.gmra.mrb[0].mxu0 %v1278_v31 }
  0xc2   : > { %1065 = vmatpush3.bf16.msra.mxu1 %v1064_v10  ;;  %1083 = vmatpush3.bf16.msra.mxu0 %v1272_v26 }
  0xc3   : > { %1066 = vmatprep.subr.bf16.mxu1 %v1190_v2  ;;  %1084 = vmatprep.subr.bf16.mxu0 %v1190_v2 }
  0xc4   : > { %1009 = vmatprep.mubr.msk.f32.mxu1 %vm1197_vm0, %v1198_v3  ;;  %1048 = vmatprep.mubr.msk.f32.mxu0 %vm1197_vm0, %v1198_v3 }
  0xc6   : > { %1068 = vmatpush3.bf16.msra.mxu1 %v1067_v11  ;;  %1086 = vmatpush3.bf16.msra.mxu0 %v1055_v48 }
  0xc7   : > { %1007 = vmatprep.subr.mxu1 %v1198_v3  ;;  %1046 = vmatprep.subr.mxu0 %v1198_v3 }
  0xca   : > { %1008 = vmatpush3.msra.mxu1 %v433_v60  ;;  %1047 = vmatpush3.msra.mxu0 %v336_v56 }
  0xcb   : > { %1010 = vmatmul.mubr.f32.vlgmr.msra.gmra.mrb[0].mxu1 %v1283_v37  ;;  %1049 = vmatmul.mubr.f32.vlgmr.msra.gmra.mrb[0].mxu0 %v1278_v31 }
 0x19e   : > { %v577_v2 = vpop.f32.mrb[0].mxu1  ;;  %v817_v12 = vpop.f32.mrb[0].mxu0 }
 0x19f   : > { %v1087_v13 = vadd.f32 %v817_v12, %v577_v2  ;;  %v1011_v14 = vpop.f32.mrb[1].mxu1  ;;  %v1050_v3 = vpop.f32.mrb[1].mxu0 }
 0x1a1   : > { %821 = vst [vmem:[%s239_s27] sm:$0xff] %v1087_v13 }
 0x1a2 PF: > { %s13_s16 = sadd.s32 1, %s1186_s16   ;;  %s1352_s12 = smov %s1178_s14 }
 0x1a3   : > { %p10_p9 = scmp.ge.s32.totalorder %s13_s16, 6   ;;  %s1353_s13 = smov %s1182_s15 }
 0x1a4   : > { %s1354_s14 = smov %s1357_s17  ;;  %s1355_s15 = smov %s1361_s18 }
 0x1a5   :  { %12 = sbr.rel (!%p10_p9) target bundleno = 3 (0x3), region = 65 }

</bundles_post_ra>
